<compile_context>
chip_gen: v7x
topology: tpu7x:2x2x1
jax: 0.10.0
libtpu: 0.0.40
codegen_flags: <defaults>
</compile_context>

<pallas_src>
import functools

import jax
import jax.numpy as jnp
import numpy as np
from jax.experimental import pallas as pl
from jax.experimental.pallas import tpu as pltpu


def _graph_embed_kernel(x_ref, w_ref, b_ref, out_ref):
    # x_ref:   (TILE_M, K*H)   rows = flattened (sample, patch) pairs
    # w_ref:   (K*H, G*D)      fused conv-weight x group-pooling matrix
    # b_ref:   (1, G*D)        group-pooled bias
    # out_ref: (TILE_M, G*D)   lane-dense output slab
    out_ref[...] = (
        jnp.dot(x_ref[...], w_ref[...], preferred_element_type=jnp.float32)
        + b_ref[...]
    )


def fuse_graph_embed_params(weight, bias, group_matrix):
    """Fold the group mean-pooling into the Conv1d parameters. Run ONCE,
    outside the per-step forward (weights/groups are static across calls)."""
    D, _, K = weight.shape
    G, H = group_matrix.shape
    # W[k*H + h, g*D + d] = M[g, h] * weight[d, 0, k]
    w_fused = jnp.einsum("gh,dk->khgd", group_matrix, weight[:, 0, :]).reshape(
        K * H, G * D
    )
    # b[g*D + d] = bias[d] * sum_h M[g, h]   (exact for arbitrary group rows)
    b_fused = (group_matrix.sum(axis=1, keepdims=True) * bias[None, :]).reshape(
        1, G * D
    )
    return w_fused, b_fused


@functools.partial(jax.jit, static_argnames=("t_patch_len", "d_model"))
def graph_embedding_forward(x, w_fused, b_fused, t_patch_len, d_model):
    """
    x:        (N, 1, T, H, 1) float32
    w_fused:  (K*H, G*D)      from fuse_graph_embed_params
    b_fused:  (1, G*D)
    returns:  (N, P*G, d_model) with P = T // t_patch_len
    """
    N, _, T, H, _ = x.shape
    K = t_patch_len
    P = T // K
    KH, GD = w_fused.shape
    D = d_model
    G = GD // D
    M = N * P

    # Free (metadata-only) reshape of the row-major input:
    #   x[n, 0, p*K + k, h, 0] -> patches[n*P + p, k*H + h]
    patches = x.reshape(M, KH)

    # --- M-axis tiling: the main perf lever ---------------------------------
    # Small problems: ONE grid step holding the whole (M, KH) block (full-extent
    # block, so the (8,128) rule holds even when M % 8 != 0).
    # Large problems: 512-row tiles (multiple of 8 sublanes), zero-padded tail.
    if M <= 1024:
        tile_m = M
    else:
        tile_m = 512
    n_tiles = -(-M // tile_m)
    m_pad = n_tiles * tile_m
    if m_pad != M:
        patches = jnp.pad(patches, ((0, m_pad - M), (0, 0)))

    # Explicit VMEM budget: double-buffered in/out tiles + resident weight/bias,
    # generous headroom, capped below every generation's safe scoped limit
    # (v7x physical VMEM is only 64 MiB).
    vmem_needed = 2 * tile_m * (KH + GD) * 4 + KH * GD * 4 + GD * 4
    vmem_limit = int(min(32 * 1024 * 1024, max(4 * 1024 * 1024, 4 * vmem_needed)))

    out = pl.pallas_call(
        _graph_embed_kernel,
        out_shape=jax.ShapeDtypeStruct((m_pad, GD), jnp.float32),
        grid_spec=pltpu.PrefetchScalarGridSpec(
            num_scalar_prefetch=0,
            grid=(n_tiles,),
            in_specs=[
                pl.BlockSpec((tile_m, KH), lambda i: (i, 0)),
                # Constant index_maps: fetched once, stay VMEM-resident across
                # the grid (no per-step re-DMA of weight/bias).
                pl.BlockSpec((KH, GD), lambda i: (0, 0)),
                pl.BlockSpec((1, GD), lambda i: (0, 0)),
            ],
            out_specs=pl.BlockSpec((tile_m, GD), lambda i: (i, 0)),
        ),
        compiler_params=pltpu.CompilerParams(
            # Independent M tiles; megacore split only pays off when each block
            # carries >>1 us of DMA (large M). Harmless for grid=(1,).
            dimension_semantics=("parallel",),
            vmem_limit_bytes=vmem_limit,
        ),
    )(patches, w_fused, b_fused)

    if m_pad != M:
        out = out[:M]
    # (M, G*D) == (N, P, G*D) -> (N, P*G, D): free row-major reshape,
    # index-identical to the torch reshape chain.
    return out.reshape(N, P * G, D)


def _reference(x, weight, bias, node_split, t_patch_len):
    """Pure numpy reference mirroring the PyTorch forward."""
    N, _, T, H, _ = x.shape
    K = t_patch_len
    P = T // K
    D = weight.shape[0]
    xs = np.squeeze(np.asarray(x), axis=(1, 4))                   # (N, T, H)
    xs = np.transpose(xs, (0, 2, 1)).reshape(N * H, 1, T)
    # Conv1d(1, D, K, stride=K): out[b,d,p] = sum_k W[d,0,k]*x[b,0,p*K+k] + bias[d]
    patches = xs[:, 0, :].reshape(N * H, P, K)                    # (N*H, P, K)
    emb = patches @ np.asarray(weight)[:, 0, :].T + np.asarray(bias)
    emb = emb.reshape(N, H, P, D).transpose(0, 2, 1, 3).reshape(N * P, H, D)
    toks = [emb[:, g, :].mean(axis=1, keepdims=True) for g in node_split]
    tok = np.concatenate(toks, axis=1)                            # (N*P, G, D)
    G = tok.shape[1]
    return tok.reshape(N, P, G, D).reshape(N, P * G, D)


if __name__ == "__main__":
    # args-equivalent hyperparameters
    his_len, pred_len, t_patch_len = 8, 8, 4
    N, H, d_model = 2, 16, 32
    T = his_len + pred_len                 # 16
    K = t_patch_len
    P = T // K                             # 4

    key = jax.random.PRNGKey(0)
    kx, kw, kb = jax.random.split(key, 3)

    # input x: (N, 1, T, H, 1)
    x = jax.random.normal(kx, (N, 1, T, H, 1), dtype=jnp.float32)

    # Conv1d(1, d_model, K) parameters, deterministic synthetic init
    weight = jax.random.normal(kw, (d_model, 1, K), dtype=jnp.float32) * 0.1
    bias = jax.random.normal(kb, (d_model,), dtype=jnp.float32) * 0.01

    # node_split: 4 contiguous groups of 4 nodes each
    node_split = [np.arange(g * 4, (g + 1) * 4, dtype=np.int32) for g in range(4)]
    G = len(node_split)
    gm = np.zeros((G, H), dtype=np.float32)
    for g, grp in enumerate(node_split):
        gm[g, grp] = 1.0 / len(grp)
    group_matrix = jnp.asarray(gm)

    # Hoisted param fusion: computed once, reused across forward calls.
    w_fused, b_fused = fuse_graph_embed_params(weight, bias, group_matrix)
    w_fused, b_fused = jax.block_until_ready((w_fused, b_fused))

    out = graph_embedding_forward(x, w_fused, b_fused, t_patch_len, d_model)
    out = jax.block_until_ready(out)

    ref = _reference(x, weight, bias, node_split, t_patch_len)
    assert out.shape == (N, P * G, d_model), out.shape
    assert np.allclose(np.asarray(out), ref, atol=1e-4, rtol=1e-4)
    print("KERNEL_OK")
</pallas_src>

<mosaic_0001>
module attributes {stable_mosaic.version = 11 : i64} {
  func.func @_graph_embed_kernel(%arg0: i32, %arg1: memref<8x64xf32, #tpu.memory_space<vmem>>, %arg2: memref<64x128xf32, #tpu.memory_space<vmem>>, %arg3: memref<1x128xf32, #tpu.memory_space<vmem>>, %arg4: memref<8x128xf32, #tpu.memory_space<vmem>>) attributes {dimension_semantics = [#tpu.dimension_semantics<parallel>], iteration_bounds = array<i64: 1>, scalar_prefetch = 0 : i64, scratch_operands = 0 : i64, tpu.core_type = #tpu.core_type<tc>, window_params = [{transform_indices = @transform_0, window_bounds = array<i64: 8, 64>}, {pipeline_mode = #tpu.pipeline_mode<synchronous>, transform_indices = @transform_1, window_bounds = array<i64: 64, 128>}, {pipeline_mode = #tpu.pipeline_mode<synchronous>, transform_indices = @transform_2, window_bounds = array<i64: 1, 128>}, {transform_indices = @transform_3, window_bounds = array<i64: 8, 128>}]} {
    %c0 = arith.constant 0 : index
    %c0_0 = arith.constant 0 : index
    %0 = vector.load %arg1[%c0, %c0_0] : memref<8x64xf32, #tpu.memory_space<vmem>>, vector<8x64xf32>
    %c0_1 = arith.constant 0 : index
    %c0_2 = arith.constant 0 : index
    %1 = vector.load %arg2[%c0_1, %c0_2] : memref<64x128xf32, #tpu.memory_space<vmem>>, vector<64x128xf32>
    %cst = arith.constant dense<0.000000e+00> : vector<8x128xf32>
    %2 = tpu.matmul %0, %1, %cst {dimension_numbers = #tpu.dot_dimension_numbers<[1], [0], [0], [1], [0, 0, 1, 1], [], []>} : vector<8x64xf32>, vector<64x128xf32>, vector<8x128xf32> -> vector<8x128xf32>
    %c0_3 = arith.constant 0 : index
    %c0_4 = arith.constant 0 : index
    %3 = vector.load %arg3[%c0_3, %c0_4] : memref<1x128xf32, #tpu.memory_space<vmem>>, vector<1x128xf32>
    %4 = vector.broadcast %3 : vector<1x128xf32> to vector<8x128xf32>
    %5 = arith.addf %2, %4 : vector<8x128xf32>
    %c0_5 = arith.constant 0 : index
    %c0_6 = arith.constant 0 : index
    %6 = vector.load %arg4[%c0_5, %c0_6] : memref<8x128xf32, #tpu.memory_space<vmem>>, vector<8x128xf32>
    tpu.vector_store %arg4[%c0_5, %c0_6], %5 {strides = array<i32>} : memref<8x128xf32, #tpu.memory_space<vmem>>, vector<8x128xf32>,
    return
  }
  func.func @transform_0(%arg0: i32) -> (i32, i32) {
    %c0_i32 = arith.constant 0 : i32
    %c0_i32_0 = arith.constant 0 : i32
    return %arg0, %c0_i32 : i32, i32
  }
  func.func @transform_1(%arg0: i32) -> (i32, i32) {
    %c0_i32 = arith.constant 0 : i32
    %c0_i32_0 = arith.constant 0 : i32
    %c0_i32_1 = arith.constant 0 : i32
    return %c0_i32, %c0_i32_0 : i32, i32
  }
  func.func @transform_2(%arg0: i32) -> (i32, i32) {
    %c0_i32 = arith.constant 0 : i32
    %c0_i32_0 = arith.constant 0 : i32
    %c0_i32_1 = arith.constant 0 : i32
    return %c0_i32, %c0_i32_0 : i32, i32
  }
  func.func @transform_3(%arg0: i32) -> (i32, i32) {
    %c0_i32 = arith.constant 0 : i32
    %c0_i32_0 = arith.constant 0 : i32
    return %arg0, %c0_i32 : i32, i32
  }
}

</mosaic_0001>

<bundles_post_ra>
// kernel: graph_embedding_forward.1
= control target key start
LH: loop header
LB: loop body
LE: loop exit
PB: predicated region body
PF: predicated region fallthrough
CT: control target
= control target key end

     0   :  { %v154_v0 = vmov 0.0|0.0   ;;  %vm155_vm0 = vmmov 0   ;;  %v156_v4 = vmov 0.0   ;;  %vm30_vm1 = vcmask 523264   ;;  %s210_s1 = inlined_call_operand.vmem [shape: f32[64,128], index: 1, kind: input, shape index: {}]   ;;  %s211_s0 = inlined_call_operand.vmem [shape: f32[8,64], index: 0, kind: input, shape index: {}]   ;;  %s212_s2 = inlined_call_operand.vmem [shape: f32[1,128], index: 2, kind: input, shape index: {}]   ;;  %s213_s3 = inlined_call_operand.vmem [shape: f32[8,128], index: 3, kind: output, shape index: {}]  }
   0x1   :  { %139 = vmatprep.subr.bf16.mxu0 %v154_v0  ;;  %v15_v1 = vld [vmem:[%s210_s1] sm:$0xff]  ;;  %v16_v2 = vld [vmem:[%s210_s1 + $0x8] sm:$0xff]  ;;  %v17_v3 = vld [vmem:[%s210_s1 + $0x10] sm:$0xff]  ;;  %136 = vmatprep.mubr.msk.f32.mxu0 %vm155_vm0, %v156_v4 }
   0x2   :  { %v140_v5 = vpack.c.bf16 %v16_v2, %v15_v1  ;;  %v18_v6 = vld [vmem:[%s210_s1 + $0x18] sm:$0xff]  ;;  %v19_v8 = vld [vmem:[%s210_s1 + $0x20] sm:$0xff]  ;;  %v20_v9 = vld [vmem:[%s210_s1 + $0x28] sm:$0xff] }
   0x3   :  { %v143_v7 = vpack.c.bf16 %v18_v6, %v17_v3  ;;  %v146_v10 = vpack.c.bf16 %v20_v9, %v19_v8  ;;  %v21_v11 = vld [vmem:[%s210_s1 + $0x30] sm:$0xff]  ;;  %v22_v12 = vld [vmem:[%s210_s1 + $0x38] sm:$0xff]  ;;  %v14_v14 = vld [vmem:[%s211_s0] sm:$0xff] }
   0x4   :  { %141 = vmatpush3.bf16.msra.mxu0 %v140_v5  ;;  %v149_v13 = vpack.c.bf16 %v22_v12, %v21_v11  ;;  %v109_v15 = vld [vmem:[%s212_s2] ss:$0 sm:$0xff] }
   0x5   :  { %142 = vmatprep.subr.bf16.mxu0 %v154_v0 }
   0x8   :  { %144 = vmatpush3.bf16.msra.mxu0 %v143_v7 }
   0x9   :  { %145 = vmatprep.subr.bf16.mxu0 %v154_v0 }
   0xc   :  { %147 = vmatpush3.bf16.msra.mxu0 %v146_v10 }
   0xd   :  { %148 = vmatprep.subr.bf16.mxu0 %v154_v0 }
  0x10   :  { %150 = vmatpush3.bf16.msra.mxu0 %v149_v13 }
  0x13   :  { %137 = vmatmul.mubr.msk.f32.vlgmr.msra.gmra.mrb[0].mxu0 %vm30_vm1, %v14_v14 }
  0xe6   :  { %v100_v16 = vpop.f32.mrb[0].mxu0 }
  0xe7   :  { %v101_v17 = vadd.f32 %v109_v15, %v100_v16  ;;  %v138_v18 = vpop.f32.mrb[1].mxu0 }
  0xe9   :  { %104 = vst [vmem:[%s213_s3] sm:$0xff] %v101_v17 }

</bundles_post_ra>
